<compile_context>
chip_gen: v7x
topology: tpu7x:2x2x1
jax: 0.10.0
libtpu: 0.0.40
codegen_flags: <defaults>
</compile_context>

<pallas_src>
import math

import jax
import jax.numpy as jnp
from jax.experimental import pallas as pl
from jax.experimental.pallas import tpu as pltpu

_LANES = 128


def _round_up(x, m):
    return ((x + m - 1) // m) * m


def _linear2x2_kernel(c_ref, x_ref, o_ref):
    """y = x @ W^T + b for IN=OUT=2 on a lane-dense interleaved (rows,128) view.

    c_ref: resident (4, 128) constants  [wa; wb_even; wb_odd; bvec]
    x_ref / o_ref: (TILE_ROWS, 128) blocks of the flattened (N, 2) matrix
                   (even lane = feature 0, odd lane = feature 1 of a row).
    """
    wa = c_ref[0:1, :]      # w00 on even lanes, w11 on odd lanes
    wb_e = c_ref[1:2, :]    # w01 on even lanes, 0 on odd lanes
    wb_o = c_ref[2:3, :]    # 0 on even lanes, w10 on odd lanes
    bvec = c_ref[3:4, :]    # b0 on even lanes,  b1 on odd lanes

    v = x_ref[...]
    # Partner fetch via XLU lane rotations (free issue slot vs. the VPU).
    v_next = pltpu.roll(v, _LANES - 1, axis=1)   # lane l -> v[(l+1) % 128]
    v_prev = pltpu.roll(v, 1, axis=1)            # lane l -> v[(l-1) % 128]
    # Wrap-around lanes are harmless: wb_e[127] == 0 and wb_o[0] == 0, and 128
    # is even so every (feature0, feature1) pair lives inside one lane row.
    o_ref[...] = (v * wa + v_next * wb_e + v_prev * wb_o + bvec).astype(o_ref.dtype)


def linear2x2_pallas(x, weight, bias, *, tile_rows=2048, min_kernel_elems=1 << 16):
    """Computes F.linear(x, weight, bias) for weight (2, 2), bias (2,)."""
    *lead, in_features = x.shape
    assert in_features == 2 and weight.shape == (2, 2) and bias.shape == (2,)
    assert x.dtype == jnp.float32, "lane/sublane layout below assumes float32"

    n = math.prod(lead) if lead else 1
    n2 = n * 2

    if n2 < min_kernel_elems:
        # Small-N fallback: pallas_call fixed cost + wrapper reshapes dominate;
        # a fused XLA elementwise path is strictly faster here.
        return x @ weight.T + bias

    # Lane-interleaved constant vectors (built once, outside the kernel).
    even = (jnp.arange(_LANES) % 2) == 0
    zero = jnp.zeros((), x.dtype)
    wa = jnp.where(even, weight[0, 0], weight[1, 1])
    wb_e = jnp.where(even, weight[0, 1], zero)
    wb_o = jnp.where(even, zero, weight[1, 0])
    bvec = jnp.where(even, bias[0], bias[1])
    const = jnp.stack([wa, wb_e, wb_o, bvec]).astype(x.dtype)   # (4, 128)

    # Lane-dense view: [x0_0, x1_0, x0_1, x1_1, ...] reshaped to (rows, 128).
    flat = x.reshape(-1)
    rows = pl.cdiv(n2, _LANES)
    ragged = rows * _LANES != n2
    if ragged:
        # Pad only to the 128-lane boundary (< 512 B); the grid handles any
        # partial last *block* by itself via pl.cdiv below.
        flat = jnp.pad(flat, (0, rows * _LANES - n2))
    x2d = flat.reshape(rows, _LANES)

    tr = min(tile_rows, _round_up(rows, 8))       # sublane-aligned tile height
    grid = (pl.cdiv(rows, tr),)

    out2d = pl.pallas_call(
        _linear2x2_kernel,
        out_shape=jax.ShapeDtypeStruct((rows, _LANES), x.dtype),
        grid=grid,
        in_specs=[
            pl.BlockSpec((4, _LANES), lambda i: (0, 0)),      # resident constants
            pl.BlockSpec((tr, _LANES), lambda i: (i, 0)),     # x tile (contiguous HBM)
        ],
        out_specs=pl.BlockSpec((tr, _LANES), lambda i: (i, 0)),
        compiler_params=pltpu.CompilerParams(
            dimension_semantics=("parallel",),
        ),
    )(const, x2d)

    if ragged:
        # TODO(synk): for very large ragged N this trailing slice costs one extra
        # copy pass; the common 128-aligned case above avoids it entirely.
        return out2d.reshape(-1)[:n2].reshape(*lead, 2)
    return out2d.reshape(*lead, 2)


class Model:
    """JAX/Pallas port of the PyTorch Model."""

    def __init__(self, key):
        k1, k2, k3, k4 = jax.random.split(key, 4)
        # linear1: Linear(2, 2) -- PyTorch default init: U(-1/sqrt(in), 1/sqrt(in))
        bound1 = 1.0 / math.sqrt(2.0)
        self.w1 = jax.random.uniform(k1, (2, 2), jnp.float32, -bound1, bound1)
        self.b1 = jax.random.uniform(k2, (2,), jnp.float32, -bound1, bound1)
        # linear2: Linear(3, 3) -- only referenced by the dead-code branch.
        bound2 = 1.0 / math.sqrt(3.0)
        self.w2 = jax.random.uniform(k3, (3, 3), jnp.float32, -bound2, bound2)
        self.b2 = jax.random.uniform(k4, (3,), jnp.float32, -bound2, bound2)

    def __call__(self, x1):
        v1 = linear2x2_pallas(x1, self.w1, self.b1)
        # v2 / y branch of the original module is dead code (and shape-inconsistent).
        return v1


if __name__ == "__main__":
    key = jax.random.PRNGKey(0)
    model = Model(key)

    def ref_fn(x):
        return x @ model.w1.T + model.b1

    # 1) Model forward at a small shape consistent with the module
    #    (last dim == linear1.in_features == 2, 4-D so permute(0,2,1,3) is sane).
    x1 = jax.random.normal(jax.random.split(key, 5)[-1], (2, 2, 3, 2), jnp.float32)
    out = jax.block_until_ready(model(x1))
    assert out.shape == (2, 2, 3, 2)
    assert jnp.allclose(out, ref_fn(x1), atol=1e-5, rtol=1e-5)

    # 2) Force the Pallas kernel on the same small input (ragged / pad path).
    out_k = jax.block_until_ready(
        linear2x2_pallas(x1, model.w1, model.b1, min_kernel_elems=0)
    )
    assert jnp.allclose(out_k, ref_fn(x1), atol=1e-5, rtol=1e-5)

    # 3) Fast path: 128-aligned element count (no pad, no slice), multi-step grid.
    xa = jax.random.normal(jax.random.PRNGKey(1), (4, 8, 32, 2), jnp.float32)
    out_a = jax.block_until_ready(
        linear2x2_pallas(xa, model.w1, model.b1, tile_rows=8, min_kernel_elems=0)
    )
    assert jnp.allclose(out_a, ref_fn(xa), atol=1e-5, rtol=1e-5)

    # 4) Ragged + partial last block (rows not a multiple of tile_rows).
    xb = jax.random.normal(jax.random.PRNGKey(2), (2, 8, 41, 2), jnp.float32)
    out_b = jax.block_until_ready(
        linear2x2_pallas(xb, model.w1, model.b1, tile_rows=8, min_kernel_elems=0)
    )
    assert jnp.allclose(out_b, ref_fn(xb), atol=1e-5, rtol=1e-5)

    print("KERNEL_OK")
</pallas_src>

<mosaic_0001>
module attributes {stable_mosaic.version = 11 : i64} {
  func.func @_linear2x2_kernel(%arg0: i32, %arg1: memref<4x128xf32, #tpu.memory_space<vmem>>, %arg2: memref<8x128xf32, #tpu.memory_space<vmem>>, %arg3: memref<8x128xf32, #tpu.memory_space<vmem>>) attributes {dimension_semantics = [#tpu.dimension_semantics<parallel>], iteration_bounds = array<i64: 1>, scalar_prefetch = 0 : i64, scratch_operands = 0 : i64, tpu.core_type = #tpu.core_type<tc>, window_params = [{pipeline_mode = #tpu.pipeline_mode<synchronous>, transform_indices = @transform_0, window_bounds = array<i64: 4, 128>}, {transform_indices = @transform_1, window_bounds = array<i64: 8, 128>}, {transform_indices = @transform_2, window_bounds = array<i64: 8, 128>}]} {
    %c0 = arith.constant 0 : index
    %c0_0 = arith.constant 0 : index
    %0 = vector.load %arg1[%c0, %c0_0] : memref<4x128xf32, #tpu.memory_space<vmem>>, vector<1x128xf32>
    %c1 = arith.constant 1 : index
    %c0_1 = arith.constant 0 : index
    %1 = vector.load %arg1[%c1, %c0_1] : memref<4x128xf32, #tpu.memory_space<vmem>>, vector<1x128xf32>
    %c2 = arith.constant 2 : index
    %c0_2 = arith.constant 0 : index
    %2 = vector.load %arg1[%c2, %c0_2] : memref<4x128xf32, #tpu.memory_space<vmem>>, vector<1x128xf32>
    %c3 = arith.constant 3 : index
    %c0_3 = arith.constant 0 : index
    %3 = vector.load %arg1[%c3, %c0_3] : memref<4x128xf32, #tpu.memory_space<vmem>>, vector<1x128xf32>
    %c0_4 = arith.constant 0 : index
    %c0_5 = arith.constant 0 : index
    %4 = vector.load %arg2[%c0_4, %c0_5] : memref<8x128xf32, #tpu.memory_space<vmem>>, vector<8x128xf32>
    %c127_i32 = arith.constant 127 : i32
    %5 = tpu.dynamic_rotate %4 by %c127_i32 dim 1 : vector<8x128xf32>, i32 -> vector<8x128xf32>
    %c1_i32 = arith.constant 1 : i32
    %6 = tpu.dynamic_rotate %4 by %c1_i32 dim 1 : vector<8x128xf32>, i32 -> vector<8x128xf32>
    %7 = vector.broadcast %0 : vector<1x128xf32> to vector<8x128xf32>
    %8 = arith.mulf %4, %7 : vector<8x128xf32>
    %9 = vector.broadcast %1 : vector<1x128xf32> to vector<8x128xf32>
    %10 = arith.mulf %5, %9 : vector<8x128xf32>
    %11 = arith.addf %8, %10 : vector<8x128xf32>
    %12 = vector.broadcast %2 : vector<1x128xf32> to vector<8x128xf32>
    %13 = arith.mulf %6, %12 : vector<8x128xf32>
    %14 = arith.addf %11, %13 : vector<8x128xf32>
    %15 = vector.broadcast %3 : vector<1x128xf32> to vector<8x128xf32>
    %16 = arith.addf %14, %15 : vector<8x128xf32>
    %c0_6 = arith.constant 0 : index
    %c0_7 = arith.constant 0 : index
    %17 = vector.load %arg3[%c0_6, %c0_7] : memref<8x128xf32, #tpu.memory_space<vmem>>, vector<8x128xf32>
    tpu.vector_store %arg3[%c0_6, %c0_7], %16 {strides = array<i32>} : memref<8x128xf32, #tpu.memory_space<vmem>>, vector<8x128xf32>,
    return
  }
  func.func @transform_0(%arg0: i32) -> (i32, i32) {
    %c0_i32 = arith.constant 0 : i32
    %c0_i32_0 = arith.constant 0 : i32
    %c0_i32_1 = arith.constant 0 : i32
    return %c0_i32, %c0_i32_0 : i32, i32
  }
  func.func @transform_1(%arg0: i32) -> (i32, i32) {
    %c0_i32 = arith.constant 0 : i32
    %c0_i32_0 = arith.constant 0 : i32
    return %arg0, %c0_i32 : i32, i32
  }
  func.func @transform_2(%arg0: i32) -> (i32, i32) {
    %c0_i32 = arith.constant 0 : i32
    %c0_i32_0 = arith.constant 0 : i32
    return %arg0, %c0_i32 : i32, i32
  }
}

</mosaic_0001>

<bundles_post_ra>
// kernel: tpu_custom_call.1
= control target key start
LH: loop header
LB: loop body
LE: loop exit
PB: predicated region body
PF: predicated region fallthrough
CT: control target
= control target key end

     0   :  { %7 = vsyncpa [#allocation3], 0  ;;  %s179_s0 = inlined_call_operand.hbm [shape: f32[4,128], index: 0, kind: input, shape index: {}]   ;;  %s180_s1 = inlined_call_operand.vmem [shape: f32[1,128], index: 1, kind: input, shape index: {}]   ;;  %s181_s2 = inlined_call_operand.hbm [shape: f32[1,128], index: 2, kind: output, shape index: {}]  }
   0x1   :  { %8 = vsyncpa [#allocation4], 0  ;;  %s130_s9 = smov [#allocation2]   ;;  %s82_s13 = scalar_lea.hbm %s179_s0, 64 }
   0x2   :  { %s15_s10 = sshll.u32 %s130_s9, 4  ;;  %p83_p0 = scmp.ne.s32.totalorder %s179_s0, %s82_s13  ;;  %s16_s10 = int_to_ptr.vmem [resolvable:$true] %s15_s10 }
   0x3   :  { %p86_p1 = scmp.lt.u32.totalorder %s82_s13, %s179_s0 }
   0x5   :  { %p88_p2 = pnand %p86_p1, %p83_p0 }
   0x7   :  { %91 = shalt.err (!%p88_p2)
}
   0x8   :  { %s92_s18 = scalar_lea.vmem %s16_s10, 64  ;;  %p97_p4 = scmp.lt.s32.totalorder %s16_s10, %s16_s10 }
   0x9   :  { %p93_p3 = scmp.ne.s32.totalorder %s16_s10, %s92_s18  ;;  %p98_p5 = scmp.lt.s32.totalorder %s92_s18, %s92_s18 }
   0xb   :  { %p99_p6 = por %p98_p5, %p97_p4 }
   0xd   :  { %p100_p7 = pnand %p99_p6, %p93_p3 }
   0xf   :  { %103 = shalt.err (!%p100_p7)
}
  0x10   :  { %18 = dma.hbm_to_vmem [thread:$0]  %s179_s0, 64, %s16_s10, [#allocation3]  }
  0x11   :  { %126 = dma.done.wait [#allocation3], 64  }
  0x12   :  { %127 = vsyncadd [#allocation3], 4294967232  ;;  %v28_v0 = vld [vmem:[%s180_s1] sm:$0xff]  ;;  %s131_s23 = smov 127   ;;  %s132_s24 = smov 1  }
  0x13   :  { %29 = vrot.lane.b32.xlu0 %v28_v0, %s131_s23  ;;  %v73_v1 = vld [vmem:[#allocation2] ss:$0 sm:$0xff]  ;;  %v74_v2 = vld [vmem:[#allocation2 + $0x1] ss:$0 sm:$0xff]  ;;  %v75_v6 = vld [vmem:[#allocation2 + $0x2] ss:$0 sm:$0xff] }
  0x14   :  { %v37_v4 = vmul.f32 %v73_v1, %v28_v0  ;;  %v76_v10 = vld [vmem:[#allocation2 + $0x3] ss:$0 sm:$0xff] }
  0x17   :  { %31 = vrot.lane.b32.xlu0 %v28_v0, %s132_s24 }
  0x85   :  { %v30_v3 = vpop.permute.xlu0 %29 }
  0x86   :  { %v42_v5 = vmul.f32 %v74_v2, %v30_v3 }
  0x88   :  { %v43_v8 = vadd.f32 %v42_v5, %v37_v4 }
  0x89   :  { %v32_v7 = vpop.permute.xlu0 %31 }
  0x8a   :  { %v48_v9 = vmul.f32 %v75_v6, %v32_v7 }
  0x8c   :  { %v49_v11 = vadd.f32 %v48_v9, %v43_v8 }
  0x8e   :  { %v54_v12 = vadd.f32 %v76_v10, %v49_v11 }
  0x90   :  { %55 = vst [vmem:[#allocation5] sm:$0xff] %v54_v12 }
  0x91   :  { %60 = vsyncadd [#allocation4], 112  ;;  %s133_s0 = smov [#allocation5]  }
  0x92   :  { %s61_s1 = sshll.u32 %s133_s0, 4  ;;  %s62_s1 = int_to_ptr.vmem [resolvable:$true] %s61_s1 }
  0x93   :  { %s104_s25 = scalar_lea.vmem %s62_s1, 16  ;;  %s108_s26 = scalar_lea.vmem %s62_s1, 128 }
  0x94   :  { %p105_p8 = scmp.ne.s32.totalorder %s62_s1, %s104_s25  ;;  %p109_p9 = scmp.lt.s32.totalorder %s62_s1, %s62_s1 }
  0x95   :  { %p110_p10 = scmp.lt.s32.totalorder %s108_s26, %s104_s25 }
  0x97   :  { %p111_p11 = por %p110_p10, %p109_p9 }
  0x99   :  { %p112_p12 = pnand %p111_p11, %p105_p8 }
  0x9b   :  { %115 = shalt.err (!%p112_p12)
}
  0x9c   :  { %s116_s29 = scalar_lea.hbm %s181_s2, 16 }
  0x9d   :  { %p117_p13 = scmp.ne.s32.totalorder %s181_s2, %s116_s29  ;;  %p120_p0 = scmp.lt.u32.totalorder %s116_s29, %s181_s2 }
  0x9f   :  { %p122_p1 = pnand %p120_p0, %p117_p13 }
  0xa1   :  { %125 = shalt.err (!%p122_p1)
}
  0xa2   :  { %s134_s6 = smov 16  }
  0xa3   :  { %67 = dma.vmem_to_hbm [thread:$0]  %s62_s1, 16, %s181_s2, [#allocation4], %s134_s6, %s134_s6, %s132_s24  }
  0xa4   :  { %128 = dma.done.wait [#allocation4], 128  }
  0xa5   :  { %129 = vsyncadd [#allocation4], 4294967168 }
  0xa6   :  { %71 = vsyncpa [#allocation3], 1 }
  0xa7   :  { %72 = vsyncpa [#allocation4], 1 }

</bundles_post_ra>
